<compile_context>
chip_gen: v7x
topology: tpu7x:2x2x1
jax: 0.10.0
libtpu: 0.0.40
codegen_flags: <defaults>
</compile_context>

<pallas_src>
import jax
import jax.numpy as jnp
from jax import lax
from jax.experimental import pallas as pl
from jax.experimental.pallas import tpu as pltpu


def _resize_conv_phase_kernel(xt_ref, w_ref, b_ref, o_ref):
    # xt_ref: (TH+2, W+2, Cin)  bf16  halo'd row tile of the 1-px padded input
    # w_ref : (4, 4*Cin, Cout)  bf16  per-phase folded 2x2 taps, phase = a*2+b
    # b_ref : (1, 4*Cout)       f32   bias tiled across the 4 phases
    # o_ref : (TH*W, 4*Cout)          phase-packed output tile
    TH2, W2, Cin = xt_ref.shape
    TH, W = TH2 - 2, W2 - 2

    xv = xt_ref[...]                                          # (TH+2, W+2, Cin)
    phase_out = []
    for ph, (a, b) in enumerate(((0, 0), (0, 1), (1, 0), (1, 1))):
        # Phase (a,b) output pixel (2p+a, 2q+b) reads x rows p+a+r-1 and cols
        # q+b+c-1 (r,c in {0,1}); in the padded, halo'd tile those are local
        # rows a+r+pr and cols b+c+q.
        taps = [xv[a + r:a + r + TH, b + c:b + c + W, :]
                for r in (0, 1) for c in (0, 1)]
        patch = jnp.concatenate(taps, axis=-1)                # (TH, W, 4*Cin)
        patch2d = patch.reshape(TH * W, 4 * Cin)
        phase_out.append(
            jnp.dot(patch2d, w_ref[ph],                       # one K=4*Cin MXU matmul
                    preferred_element_type=jnp.float32))      # (TH*W, Cout) f32
    out = jnp.concatenate(phase_out, axis=-1) + b_ref[...]    # (TH*W, 4*Cout)
    o_ref[...] = out.astype(o_ref.dtype)


def resize_conv_pallas(x_nchw, weight_oihw, bias, *, tile_h=8):
    """ResizeConv forward: 2x nearest upsample + Conv2d(k=3, pad=1).

    x_nchw: (N, Cin, H, W); weight_oihw: (Cout, Cin, 3, 3); bias: (Cout,).
    Returns (N, Cout, 2H, 2W) in x's dtype.
    """
    N, Cin, H, W = x_nchw.shape
    Cout = weight_oihw.shape[0]
    TH = min(tile_h, H)
    assert H % TH == 0, f"H={H} must be divisible by tile_h={TH}"
    nT = H // TH

    # ---- zero-FLOP wrapper glue: NCHW->NHWC, 1-px pad, halo'd row tiles ----
    x_nhwc = jnp.transpose(x_nchw, (0, 2, 3, 1))                      # (N,H,W,Cin)
    xp = jnp.pad(x_nhwc, ((0, 0), (1, 1), (1, 1), (0, 0)))            # (N,H+2,W+2,Cin)
    # Block-aligned halo tiles (duplicates only 2 rows per tile) so the Pallas
    # pipeline double-buffers them with plain BlockSpecs — no manual DMA.
    xt = jnp.stack([xp[:, t * TH:t * TH + TH + 2] for t in range(nT)],
                   axis=1)                                            # (N,nT,TH+2,W+2,Cin)
    xt = xt.astype(jnp.bfloat16)                                      # halve input HBM traffic

    # ---- fold 3x3 taps into per-phase 2x2 taps (sub-pixel decomposition) ----
    W33 = jnp.transpose(weight_oihw.astype(jnp.float32), (2, 3, 1, 0))  # [ky,kx]->(Cin,Cout)
    # Original 3x3 tap indices contributing to x-offset (r-1+a) rows / (c-1+b) cols:
    tap_sets = {(0, 0): (0,), (0, 1): (1, 2), (1, 0): (0, 1), (1, 1): (2,)}

    def phase_weight(a, b):
        blocks = []
        for r in (0, 1):
            for c in (0, 1):
                wsum = jnp.zeros((Cin, Cout), jnp.float32)
                for ky in tap_sets[(a, r)]:
                    for kx in tap_sets[(b, c)]:
                        wsum = wsum + W33[ky, kx]
                blocks.append(wsum)
        return jnp.concatenate(blocks, axis=0)                        # (4*Cin, Cout)

    w_all = jnp.stack([phase_weight(a, b) for a in (0, 1) for b in (0, 1)])
    w_all = w_all.astype(jnp.bfloat16)                                # (4, 4*Cin, Cout)
    b4 = jnp.tile(bias.astype(jnp.float32).reshape(1, Cout), (1, 4))  # (1, 4*Cout)

    out_itemsize = jnp.dtype(x_nchw.dtype).itemsize

    # Advisory cost + a derived (generous, clamped) scoped-VMEM budget.
    def _lane_pad(n):
        return -(-n // 128) * 128

    flops = 2 * N * nT * 4 * (TH * W) * (4 * Cin) * Cout
    bytes_accessed = (xt.size * 2 + w_all.size * 2 + b4.size * 4
                      + N * nT * TH * W * 4 * Cout * out_itemsize)
    vmem_est = 2 * (
        (TH + 2) * (W + 2) * _lane_pad(Cin) * 2          # input tile (dbl-buffered)
        + 4 * (4 * Cin) * _lane_pad(Cout) * 2            # folded weights
        + 8 * _lane_pad(4 * Cout) * 4                    # bias
        + TH * W * _lane_pad(4 * Cout) * out_itemsize)   # output tile
    vmem_limit = int(min(48 * 1024 * 1024, max(16 * 1024 * 1024, 4 * vmem_est)))

    out = pl.pallas_call(
        _resize_conv_phase_kernel,
        out_shape=jax.ShapeDtypeStruct((N, nT, TH * W, 4 * Cout), x_nchw.dtype),
        grid=(N, nT),
        in_specs=[
            pl.BlockSpec((None, None, TH + 2, W + 2, Cin),
                         lambda n, t: (n, t, 0, 0, 0)),
            pl.BlockSpec((4, 4 * Cin, Cout), lambda n, t: (0, 0, 0)),
            pl.BlockSpec((1, 4 * Cout), lambda n, t: (0, 0)),
        ],
        out_specs=pl.BlockSpec((None, None, TH * W, 4 * Cout),
                               lambda n, t: (n, t, 0, 0)),
        compiler_params=pltpu.CompilerParams(
            dimension_semantics=("parallel", "parallel"),
            vmem_limit_bytes=vmem_limit,
        ),
        cost_estimate=pl.CostEstimate(flops=flops, transcendentals=0,
                                      bytes_accessed=bytes_accessed),
    )(xt, w_all, b4)

    # ---- zero-FLOP glue: de-interleave the 4 phases into (N, Cout, 2H, 2W) ----
    out = out.reshape(N, nT, TH, W, 2, 2, Cout)        # (n, t, pr, q, a, b, c)
    out = jnp.transpose(out, (0, 6, 1, 2, 4, 3, 5))    # (n, c, t, pr, a, q, b)
    return out.reshape(N, Cout, 2 * H, 2 * W)


def _reference(x_nchw, weight_oihw, bias):
    """Pure-JAX reference of Upsample(2, 'nearest') + Conv2d(k=3, pad=1)."""
    up = jnp.repeat(jnp.repeat(x_nchw, 2, axis=2), 2, axis=3)
    y = lax.conv_general_dilated(
        up, weight_oihw, window_strides=(1, 1), padding="SAME",
        dimension_numbers=("NCHW", "OIHW", "NCHW"))
    return y + bias[None, :, None, None]


if __name__ == "__main__":
    key = jax.random.PRNGKey(0)
    kx, kw, kb = jax.random.split(key, 3)

    N, Cin, H, W = 2, 4, 16, 16
    Cout = 8

    x = jax.random.normal(kx, (N, Cin, H, W), dtype=jnp.float32)
    # Deterministic synthetic parameters (PyTorch-style OIHW conv weight).
    weight = 0.1 * jax.random.normal(kw, (Cout, Cin, 3, 3), dtype=jnp.float32)
    bias = 0.1 * jax.random.normal(kb, (Cout,), dtype=jnp.float32)

    out = resize_conv_pallas(x, weight, bias)
    out = jax.block_until_ready(out)

    ref = _reference(x, weight, bias)
    assert out.shape == (N, Cout, 2 * H, 2 * W), out.shape
    # bf16 MXU operands with f32 accumulation -> relaxed tolerance.
    assert jnp.allclose(out, ref, atol=5e-2, rtol=5e-2), (
        float(jnp.max(jnp.abs(out - ref))))

    print("KERNEL_OK")
</pallas_src>

<mosaic_0001>
module attributes {stable_mosaic.version = 11 : i64} {
  func.func @_resize_conv_phase_kernel(%arg0: i32, %arg1: i32, %arg2: memref<1x1x10x18x4xbf16, #tpu.memory_space<vmem>>, %arg3: memref<4x16x8xbf16, #tpu.memory_space<vmem>>, %arg4: memref<1x32xf32, #tpu.memory_space<vmem>>, %arg5: memref<1x1x128x32xf32, #tpu.memory_space<vmem>>) attributes {dimension_semantics = [#tpu.dimension_semantics<parallel>, #tpu.dimension_semantics<parallel>], iteration_bounds = array<i64: 2, 2>, scalar_prefetch = 0 : i64, scratch_operands = 0 : i64, tpu.core_type = #tpu.core_type<tc>, window_params = [{transform_indices = @transform_0, window_bounds = array<i64: 1, 1, 10, 18, 4>}, {pipeline_mode = #tpu.pipeline_mode<synchronous>, transform_indices = @transform_1, window_bounds = array<i64: 4, 16, 8>}, {pipeline_mode = #tpu.pipeline_mode<synchronous>, transform_indices = @transform_2, window_bounds = array<i64: 1, 32>}, {transform_indices = @transform_3, window_bounds = array<i64: 1, 1, 128, 32>}]} {
    %c0 = arith.constant 0 : index
    %c0_0 = arith.constant 0 : index
    %c0_1 = arith.constant 0 : index
    %c0_2 = arith.constant 0 : index
    %c0_3 = arith.constant 0 : index
    %0 = vector.load %arg2[%c0, %c0_0, %c0_1, %c0_2, %c0_3] : memref<1x1x10x18x4xbf16, #tpu.memory_space<vmem>>, vector<1x1x10x18x4xbf16>
    %1 = vector.shape_cast %0 : vector<1x1x10x18x4xbf16> to vector<10x18x4xbf16>
    %2 = vector.extract_strided_slice %1 {offsets = [0, 0, 0], sizes = [8, 16, 4], strides = [1, 1, 1]} : vector<10x18x4xbf16> to vector<8x16x4xbf16>
    %3 = vector.extract_strided_slice %1 {offsets = [0, 1, 0], sizes = [8, 16, 4], strides = [1, 1, 1]} : vector<10x18x4xbf16> to vector<8x16x4xbf16>
    %4 = vector.extract_strided_slice %1 {offsets = [1, 0, 0], sizes = [8, 16, 4], strides = [1, 1, 1]} : vector<10x18x4xbf16> to vector<8x16x4xbf16>
    %5 = vector.extract_strided_slice %1 {offsets = [1, 1, 0], sizes = [8, 16, 4], strides = [1, 1, 1]} : vector<10x18x4xbf16> to vector<8x16x4xbf16>
    %6 = tpu.concatenate %2, %3, %4, %5 in 2 : vector<8x16x4xbf16>, vector<8x16x4xbf16>, vector<8x16x4xbf16>, vector<8x16x4xbf16> -> vector<8x16x16xbf16>
    %7 = vector.shape_cast %6 : vector<8x16x16xbf16> to vector<128x16xbf16>
    %c0_4 = arith.constant 0 : index
    %c0_5 = arith.constant 0 : index
    %c0_6 = arith.constant 0 : index
    %8 = vector.load %arg3[%c0_4, %c0_5, %c0_6] : memref<4x16x8xbf16, #tpu.memory_space<vmem>>, vector<1x16x8xbf16>
    %9 = vector.shape_cast %8 : vector<1x16x8xbf16> to vector<16x8xbf16>
    %cst = arith.constant dense<0.000000e+00> : vector<128x8xf32>
    %10 = tpu.matmul %7, %9, %cst {dimension_numbers = #tpu.dot_dimension_numbers<[1], [0], [0], [1], [0, 0, 1, 1], [], []>} : vector<128x16xbf16>, vector<16x8xbf16>, vector<128x8xf32> -> vector<128x8xf32>
    %11 = vector.extract_strided_slice %1 {offsets = [0, 1, 0], sizes = [8, 16, 4], strides = [1, 1, 1]} : vector<10x18x4xbf16> to vector<8x16x4xbf16>
    %12 = vector.extract_strided_slice %1 {offsets = [0, 2, 0], sizes = [8, 16, 4], strides = [1, 1, 1]} : vector<10x18x4xbf16> to vector<8x16x4xbf16>
    %13 = vector.extract_strided_slice %1 {offsets = [1, 1, 0], sizes = [8, 16, 4], strides = [1, 1, 1]} : vector<10x18x4xbf16> to vector<8x16x4xbf16>
    %14 = vector.extract_strided_slice %1 {offsets = [1, 2, 0], sizes = [8, 16, 4], strides = [1, 1, 1]} : vector<10x18x4xbf16> to vector<8x16x4xbf16>
    %15 = tpu.concatenate %11, %12, %13, %14 in 2 : vector<8x16x4xbf16>, vector<8x16x4xbf16>, vector<8x16x4xbf16>, vector<8x16x4xbf16> -> vector<8x16x16xbf16>
    %16 = vector.shape_cast %15 : vector<8x16x16xbf16> to vector<128x16xbf16>
    %c1 = arith.constant 1 : index
    %c0_7 = arith.constant 0 : index
    %c0_8 = arith.constant 0 : index
    %17 = vector.load %arg3[%c1, %c0_7, %c0_8] : memref<4x16x8xbf16, #tpu.memory_space<vmem>>, vector<1x16x8xbf16>
    %18 = vector.shape_cast %17 : vector<1x16x8xbf16> to vector<16x8xbf16>
    %cst_9 = arith.constant dense<0.000000e+00> : vector<128x8xf32>
    %19 = tpu.matmul %16, %18, %cst_9 {dimension_numbers = #tpu.dot_dimension_numbers<[1], [0], [0], [1], [0, 0, 1, 1], [], []>} : vector<128x16xbf16>, vector<16x8xbf16>, vector<128x8xf32> -> vector<128x8xf32>
    %20 = vector.extract_strided_slice %1 {offsets = [1, 0, 0], sizes = [8, 16, 4], strides = [1, 1, 1]} : vector<10x18x4xbf16> to vector<8x16x4xbf16>
    %21 = vector.extract_strided_slice %1 {offsets = [1, 1, 0], sizes = [8, 16, 4], strides = [1, 1, 1]} : vector<10x18x4xbf16> to vector<8x16x4xbf16>
    %22 = vector.extract_strided_slice %1 {offsets = [2, 0, 0], sizes = [8, 16, 4], strides = [1, 1, 1]} : vector<10x18x4xbf16> to vector<8x16x4xbf16>
    %23 = vector.extract_strided_slice %1 {offsets = [2, 1, 0], sizes = [8, 16, 4], strides = [1, 1, 1]} : vector<10x18x4xbf16> to vector<8x16x4xbf16>
    %24 = tpu.concatenate %20, %21, %22, %23 in 2 : vector<8x16x4xbf16>, vector<8x16x4xbf16>, vector<8x16x4xbf16>, vector<8x16x4xbf16> -> vector<8x16x16xbf16>
    %25 = vector.shape_cast %24 : vector<8x16x16xbf16> to vector<128x16xbf16>
    %c2 = arith.constant 2 : index
    %c0_10 = arith.constant 0 : index
    %c0_11 = arith.constant 0 : index
    %26 = vector.load %arg3[%c2, %c0_10, %c0_11] : memref<4x16x8xbf16, #tpu.memory_space<vmem>>, vector<1x16x8xbf16>
    %27 = vector.shape_cast %26 : vector<1x16x8xbf16> to vector<16x8xbf16>
    %cst_12 = arith.constant dense<0.000000e+00> : vector<128x8xf32>
    %28 = tpu.matmul %25, %27, %cst_12 {dimension_numbers = #tpu.dot_dimension_numbers<[1], [0], [0], [1], [0, 0, 1, 1], [], []>} : vector<128x16xbf16>, vector<16x8xbf16>, vector<128x8xf32> -> vector<128x8xf32>
    %29 = vector.extract_strided_slice %1 {offsets = [1, 1, 0], sizes = [8, 16, 4], strides = [1, 1, 1]} : vector<10x18x4xbf16> to vector<8x16x4xbf16>
    %30 = vector.extract_strided_slice %1 {offsets = [1, 2, 0], sizes = [8, 16, 4], strides = [1, 1, 1]} : vector<10x18x4xbf16> to vector<8x16x4xbf16>
    %31 = vector.extract_strided_slice %1 {offsets = [2, 1, 0], sizes = [8, 16, 4], strides = [1, 1, 1]} : vector<10x18x4xbf16> to vector<8x16x4xbf16>
    %32 = vector.extract_strided_slice %1 {offsets = [2, 2, 0], sizes = [8, 16, 4], strides = [1, 1, 1]} : vector<10x18x4xbf16> to vector<8x16x4xbf16>
    %33 = tpu.concatenate %29, %30, %31, %32 in 2 : vector<8x16x4xbf16>, vector<8x16x4xbf16>, vector<8x16x4xbf16>, vector<8x16x4xbf16> -> vector<8x16x16xbf16>
    %34 = vector.shape_cast %33 : vector<8x16x16xbf16> to vector<128x16xbf16>
    %c3 = arith.constant 3 : index
    %c0_13 = arith.constant 0 : index
    %c0_14 = arith.constant 0 : index
    %35 = vector.load %arg3[%c3, %c0_13, %c0_14] : memref<4x16x8xbf16, #tpu.memory_space<vmem>>, vector<1x16x8xbf16>
    %36 = vector.shape_cast %35 : vector<1x16x8xbf16> to vector<16x8xbf16>
    %cst_15 = arith.constant dense<0.000000e+00> : vector<128x8xf32>
    %37 = tpu.matmul %34, %36, %cst_15 {dimension_numbers = #tpu.dot_dimension_numbers<[1], [0], [0], [1], [0, 0, 1, 1], [], []>} : vector<128x16xbf16>, vector<16x8xbf16>, vector<128x8xf32> -> vector<128x8xf32>
    %38 = tpu.concatenate %10, %19, %28, %37 in 1 : vector<128x8xf32>, vector<128x8xf32>, vector<128x8xf32>, vector<128x8xf32> -> vector<128x32xf32>
    %c0_16 = arith.constant 0 : index
    %c0_17 = arith.constant 0 : index
    %39 = vector.load %arg4[%c0_16, %c0_17] : memref<1x32xf32, #tpu.memory_space<vmem>>, vector<1x32xf32>
    %40 = vector.broadcast %39 : vector<1x32xf32> to vector<128x32xf32>
    %41 = arith.addf %38, %40 : vector<128x32xf32>
    %c0_18 = arith.constant 0 : index
    %c0_19 = arith.constant 0 : index
    %c0_20 = arith.constant 0 : index
    %c0_21 = arith.constant 0 : index
    %42 = vector.load %arg5[%c0_18, %c0_19, %c0_20, %c0_21] : memref<1x1x128x32xf32, #tpu.memory_space<vmem>>, vector<1x1x128x32xf32>
    %43 = vector.shape_cast %42 : vector<1x1x128x32xf32> to vector<128x32xf32>
    %44 = vector.shape_cast %41 : vector<128x32xf32> to vector<1x1x128x32xf32>
    tpu.vector_store %arg5[%c0_18, %c0_19, %c0_20, %c0_21], %44 {strides = array<i32>} : memref<1x1x128x32xf32, #tpu.memory_space<vmem>>, vector<1x1x128x32xf32>,
    return
  }
  func.func @transform_0(%arg0: i32, %arg1: i32) -> (i32, i32, i32, i32, i32) {
    %c0_i32 = arith.constant 0 : i32
    %c0_i32_0 = arith.constant 0 : i32
    %c0_i32_1 = arith.constant 0 : i32
    %c0_i32_2 = arith.constant 0 : i32
    return %arg0, %arg1, %c0_i32, %c0_i32_0, %c0_i32_1 : i32, i32, i32, i32, i32
  }
  func.func @transform_1(%arg0: i32, %arg1: i32) -> (i32, i32, i32) {
    %c0_i32 = arith.constant 0 : i32
    %c0_i32_0 = arith.constant 0 : i32
    %c0_i32_1 = arith.constant 0 : i32
    %c0_i32_2 = arith.constant 0 : i32
    return %c0_i32, %c0_i32_0, %c0_i32_1 : i32, i32, i32
  }
  func.func @transform_2(%arg0: i32, %arg1: i32) -> (i32, i32) {
    %c0_i32 = arith.constant 0 : i32
    %c0_i32_0 = arith.constant 0 : i32
    %c0_i32_1 = arith.constant 0 : i32
    return %c0_i32, %c0_i32_0 : i32, i32
  }
  func.func @transform_3(%arg0: i32, %arg1: i32) -> (i32, i32, i32, i32) {
    %c0_i32 = arith.constant 0 : i32
    %c0_i32_0 = arith.constant 0 : i32
    %c0_i32_1 = arith.constant 0 : i32
    return %arg0, %arg1, %c0_i32, %c0_i32_0 : i32, i32, i32, i32
  }
}

</mosaic_0001>

<bundles_post_ra>
// kernel: tpu_custom_call.1
= control target key start
LH: loop header
LB: loop body
LE: loop exit
PB: predicated region body
PF: predicated region fallthrough
CT: control target
= control target key end

     0   :  { %s1931_s12 = smov 0   ;;  %s1933_s13 = smov 0   ;;  %s2572_s0 = inlined_call_operand.vmem [shape: bf16[2,2,10,18,4], index: 0, kind: input, shape index: {}]   ;;  %s2573_s1 = inlined_call_operand.vmem [shape: bf16[4,16,8], index: 1, kind: input, shape index: {}]   ;;  %s2574_s2 = inlined_call_operand.vmem [shape: f32[1,32], index: 2, kind: input, shape index: {}]   ;;  %s2575_s3 = inlined_call_operand.vmem [shape: f32[2,2,128,32], index: 3, kind: output, shape index: {}]  }
   0x1   :  { %s1935_s14 = smov 0   ;;  %s1937_s15 = smov 0  }
   0x2   :  { %s1939_s16 = smov 0  }
   0x3 LB: > { %s22_s17 = sadd.s32 1, %s1896_s14  ;;  %s25_s18 = sadd.s32 1, %s1900_s15  ;;  %s1904_s16 = sphi %s1939_s16, %s13_s16   ;;  %s1900_s15 = sphi %s1937_s15, %s2579_s15   ;;  %s1896_s14 = sphi %s1935_s14, %s2578_s14   ;;  %s1892_s13 = sphi %s1933_s13, %s2577_s13   ;;  %s1888_s12 = sphi %s1931_s12, %s2576_s12  }
   0x4   : > { %p23_p0 = scmp.ge.s32.totalorder %s22_s17, 2  ;;  %p1617_p1 = scmp.ge.s32.totalorder %s1904_s16, 1 }
   0x5   : > { %p157_p2 = scmp.lt.s32.totalorder %s1904_s16, 5 }
   0x6   : > { %s2581_s17 = smov (%p23_p0, %s22_s17), 0  ;;  %s2583_s18 = smov (!%p23_p0, %s25_s18), %s1900_s15 }
   0x7   : > { %p158_p3 = pnand %p1617_p1, %p157_p2  ;;  %p27_p4 = scmp.ge.s32.totalorder %s2583_s18, 2 }
   0x8   : > { %p189_p5 = scmp.lt.s32.totalorder (!%p158_p3), %s1892_s13, 1  ;;  %p191_p6 = scmp.lt.s32.totalorder (!%p158_p3), %s1888_s12, 1  ;;  %vm302_vm0 = vsmask.f32 (!%p158_p3), 7424  ;;  %v1860_v37 = vld [vmem:[%s2573_s1] sm:$0xff] (!%p158_p3)   ;;  %v1862_v40 = vld [vmem:[%s2573_s1 + $0x8] sm:$0xff] (!%p158_p3)  }
   0x9   : > { %s2585_s18 = smov (%p27_p4, %s2583_s18), 0  ;;  %161 = sbr.rel (%p158_p3) target bundleno = 643 (0x283), region = 32 }
   0xa   : > { %s1906_s26 = smov (!%p158_p3), 8   ;;  %s1907_s27 = smov (!%p158_p3), 4   ;;  %1723 = vmatprep.subr.bf16.mxu0 (!%p158_p3), %v1860_v37  ;;  %1741 = vmatprep.subr.bf16.mxu1 (!%p158_p3), %v1862_v40  ;;  %vm467_vm1 = vcmask (!%p158_p3), 31744   ;;  %vm484_vm2 = vcmask (!%p158_p3), 64512   ;;  %vm501_vm3 = vcmask (!%p158_p3), 97280   ;;  %vm526_vm4 = vcmask (!%p158_p3), 130048  }
   0xb   : > { %s1908_s28 = smov (!%p158_p3), 12   ;;  %1724 = vmatpush3.bf16.msra.mxu0 (!%p158_p3), %v1860_v37  ;;  %1742 = vmatpush3.bf16.msra.mxu1 (!%p158_p3), %v1862_v40  ;;  %s1909_s10 = smov (!%p158_p3), 16   ;;  %vm1461_vm5 = vcmask (!%p158_p3), 195584   ;;  %vm1501_vm6 = vcmask (!%p158_p3), 261120  }
   0xc   : > { %s1910_s11 = smov (!%p158_p3), 24  }
  0x10   : > { %s2587_s13 = smov (!%p189_p5, %s1892_s13), 1  ;;  %s2589_s12 = smov (!%p191_p6, %s1888_s12), 1 }
  0x11   : > { %s1796_s19 = smul.u32 60, %s2587_s13 }
  0x12   : > { %s1795_s20 = smul.u32 30, %s2589_s12 }
  0x14   : > { %s195_s21 = sadd.s32 %s1796_s19, %s1795_s20  ;;  %s1619_s19 = sshll.u32 %s2589_s12, 4 }
  0x15   : > { %s1618_s22 = sshll.u32 %s195_s21, 2  ;;  %s1620_s20 = sshll.u32 %s2587_s13, 5 }
  0x16   : > { %s1970_s25 = scalar_lea.vmem %s2572_s0, %s1618_s22  ;;  %s204_s21 = sadd.s32 %s1620_s20, %s1619_s19 }
  0x17   : > { %v1973_v0 = vld [vmem:[%s1970_s25 + $0xc] sm:$0xff]   ;;  %v1976_v1 = vld [vmem:[%s1970_s25 + $0x14] ss:$0 sps:$4 sm:$0x11]   ;;  %v1979_v2 = vld [vmem:[%s1970_s25 + $0x18] sm:$0xff]   ;;  %s1621_s22 = sshll.u32 %s204_s21, 3 }
  0x18   : > { %420 = vrot.lane.b32.xlu1 %v1973_v0, %s1906_s26  ;;  %672 = vrot.lane.b32.xlu0 %v1976_v1, %s1906_s26  ;;  %v1986_v3 = vld [vmem:[%s1970_s25] sm:$0xff]   ;;  %v1989_v4 = vld [vmem:[%s1970_s25 + $0x8] ss:$0 sps:$4 sm:$0x11]   ;;  %v318_v5 = vshll.u32 %v1973_v0, 16  ;;  %v316_v8 = vshrl.u32 %v1973_v0, 16 }
  0x19   : > { %v304_v6 = vshrl.u32 %v1986_v3, 16  ;;  %v306_v7 = vshll.u32 %v1986_v3, 16  ;;  %v323_v9 = vshll.u32 %v1976_v1, 16  ;;  %v311_v10 = vshll.u32 %v1989_v4, 16  ;;  %v2001_v14 = vld [vmem:[%s1970_s25 + $0x24] sm:$0xff]   ;;  %v2038_v41 = vld [vmem:[%s1970_s25 + $0x30] sm:$0xff]  }
  0x1a   : > { %v640_v11 = vshrl.u32 %v1989_v4, 16  ;;  %v320_v12 = vrot.slane %v318_v5, 1  ;;  %v2004_v19 = vld [vmem:[%s1970_s25 + $0x20] ss:$0 sps:$4 sm:$0x11]   ;;  %v330_v20 = vshll.u32 %v1979_v2, 16 }
  0x1b   : > { %v308_v13 = vrot.slane %v306_v7, 1  ;;  %v313_v15 = vrot.slane %v311_v10, 1  ;;  %v325_v18 = vrot.slane %v323_v9, 1  ;;  %v642_v21 = vshrl.u32 %v1976_v1, 16  ;;  %v2048_v44 = vld [vmem:[%s1970_s25 + $0x3c] sm:$0xff]   ;;  %v2076_v61 = vld [vmem:[%s1970_s25 + $0x48] sm:$0xff]  }
  0x1c   : > { %422 = vrot.lane.b32.xlu1 %v1979_v2, %s1906_s26  ;;  %v321_v17 = vor.u32 %v320_v12, %v316_v8  ;;  %v2011_v23 = vld [vmem:[%s1970_s25 + $0x2c] ss:$0 sps:$4 sm:$0x11]   ;;  %v342_v24 = vshll.u32 %v2001_v14, 16  ;;  %v328_v25 = vshrl.u32 %v1979_v2, 16  ;;  %v332_v27 = vrot.slane %v330_v20, 1 }
  0x1d   : > { %v309_v16 = vor.u32 %v308_v13, %v304_v6  ;;  %v335_v28 = vshll.u32 %v2004_v19, 16  ;;  %v340_v29 = vshrl.u32 %v2001_v14, 16  ;;  %v347_v31 = vshll.u32 %v2011_v23, 16  ;;  %v2042_v42 = vld [vmem:[%s1970_s25 + $0x38] ss:$0 sps:$4 sm:$0x11]  }
  0x1e   : > { %v326_v26 = vsel %vm302_vm0, %v321_v17, %v325_v18  ;;  %v344_v30 = vrot.slane %v342_v24, 1  ;;  %v333_v32 = vor.u32 %v332_v27, %v328_v25  ;;  %v644_v34 = vshrl.u32 %v2004_v19, 16  ;;  %v2056_v49 = vld [vmem:[%s1970_s25 + $0x44] ss:$0 sps:$4 sm:$0x11]   ;;  %v2086_v5 = vld [vmem:[%s1970_s25 + $0x54] sm:$0xff]  }
  0x1f   : > { %v314_v22 = vsel %vm302_vm0, %v309_v16, %v313_v15  ;;  %v337_v33 = vrot.slane %v335_v28, 1  ;;  %v349_v36 = vrot.slane %v347_v31, 1  ;;  %v354_v43 = vshll.u32 %v2038_v41, 16  ;;  %v2080_v62 = vld [vmem:[%s1970_s25 + $0x50] ss:$0 sps:$4 sm:$0x11]  }
  0x20   : > { %656 = vrot.lane.b32.xlu1 %v640_v11, %s1907_s27  ;;  %399 = vrot.lane.b32.xlu0 %v314_v22, %s1907_s27  ;;  %v345_v35 = vor.u32 %v344_v30, %v340_v29  ;;  %v352_v45 = vshrl.u32 %v2038_v41, 16  ;;  %v359_v47 = vshll.u32 %v2042_v42, 16  ;;  %v646_v48 = vshrl.u32 %v2011_v23, 16  ;;  %v2094_v10 = vld [vmem:[%s1970_s25 + $0x5c] ss:$0 sps:$4 sm:$0x11]  }
  0x21   : > { %v338_v38 = vsel %vm302_vm0, %v333_v32, %v337_v33  ;;  %v356_v46 = vrot.slane %v354_v43, 1  ;;  %v366_v50 = vshll.u32 %v2048_v44, 16  ;;  %v364_v53 = vshrl.u32 %v2048_v44, 16  ;;  %v2111_v24 = vld [vmem:[%s2573_s1 + $0x10] sm:$0xff]   ;;  %v2133_v29 = vld [vmem:[%s2573_s1 + $0x18] sm:$0xff]  }
  0x22   : > { %v350_v39 = vsel %vm302_vm0, %v345_v35, %v349_v36  ;;  %v361_v52 = vrot.slane %v359_v47, 1  ;;  %v371_v55 = vshll.u32 %v2056_v49, 16  ;;  %v648_v57 = vshrl.u32 %v2042_v42, 16  ;;  %1759 = vmatprep.subr.bf16.mxu0 %v2111_v24  ;;  %v2124_v27 = vld [vmem:[%s1970_s25 + $0x68] ss:$0 sps:$4 sm:$0x11]   ;;  %1777 = vmatprep.subr.bf16.mxu1 %v2133_v29 }
  0x23   : > { %v357_v51 = vor.u32 %v356_v46, %v352_v45  ;;  %v368_v54 = vrot.slane %v366_v50, 1  ;;  %v378_v63 = vshll.u32 %v2076_v61, 16  ;;  %v376_v6 = vshrl.u32 %v2076_v61, 16  ;;  %v1861_v37 = vld [vmem:[%s1970_s25 + $0x6c] sm:$0xff]  }
  0x24   : > { %658 = vrot.lane.b32.xlu1 %v642_v21, %s1907_s27  ;;  %401 = vrot.lane.b32.xlu0 %v326_v26, %s1907_s27  ;;  %v373_v59 = vrot.slane %v371_v55, 1  ;;  %v383_v8 = vshll.u32 %v2080_v62, 16  ;;  %v650_v9 = vshrl.u32 %v2056_v49, 16  ;;  %v390_v11 = vshll.u32 %v2086_v5, 16 }
  0x25   : > { %v362_v56 = vsel %vm302_vm0, %v357_v51, %v361_v52  ;;  %v369_v58 = vor.u32 %v368_v54, %v364_v53  ;;  %v380_v7 = vrot.slane %v378_v63, 1  ;;  %v388_v15 = vshrl.u32 %v2086_v5, 16  ;;  %v1863_v40 = vld [vmem:[%s1970_s25 + $0x74] ss:$0 sps:$4 sm:$0x11]  }
  0x26   : > { %v385_v13 = vrot.slane %v383_v8, 1  ;;  %v392_v16 = vrot.slane %v390_v11, 1  ;;  %v395_v17 = vshll.u32 %v2094_v10, 16  ;;  %v652_v20 = vshrl.u32 %v2080_v62, 16 }
  0x27   : > { %v374_v60 = vsel %vm302_vm0, %v369_v58, %v373_v59  ;;  %v381_v12 = vor.u32 %v380_v7, %v376_v6  ;;  %v447_v32 = vshll.u32 %v2124_v27, 16  ;;  %v654_v33 = vshrl.u32 %v2094_v10, 16 }
  0x28   : > { %674 = vrot.lane.b32.xlu1 %v2004_v19, %s1906_s26  ;;  %451 = vrot.lane.b32.xlu0 %v326_v26, %s1908_s28  ;;  %v397_v22 = vrot.slane %v395_v17, 1  ;;  %v2120_v26 = vld [vmem:[%s1970_s25 + $0x60] sm:$0xff]   ;;  %v977_v43 = vshrl.u32 %v1861_v37, 16  ;;  %v984_v46 = vshll.u32 %v1863_v40, 16  ;;  %v1108_v50 = vshrl.u32 %v1863_v40, 16  ;;  %s2442_s25 = scalar_lea.vmem %s2575_s3, %s1621_s22 }
  0x29   : > { %v386_v18 = vsel %vm302_vm0, %v381_v12, %v385_v13  ;;  %v442_v28 = vshll.u32 %v2120_v26, 16  ;;  %v440_v30 = vshrl.u32 %v2120_v26, 16  ;;  %v449_v35 = vrot.slane %v447_v32, 1 }
  0x2b   : > { %v444_v31 = vrot.slane %v442_v28, 1 }
  0x2c   : > { %692 = vrot.lane.b32.xlu1 %v644_v34, %s1908_s28  ;;  %453 = vrot.lane.b32.xlu0 %v338_v38, %s1908_s28 }
  0x30   : > { %405 = vrot.lane.b32.xlu1 %v350_v39, %s1907_s27  ;;  %690 = vrot.lane.b32.xlu0 %v642_v21, %s1908_s28  ;;  %v393_v21 = vor.u32 %v392_v16, %v388_v15 }
  0x32   : > { %v398_v25 = vsel %vm302_vm0, %v393_v21, %v397_v22 }
  0x34   : > { %426 = vrot.lane.b32.xlu1 %v2038_v41, %s1906_s26  ;;  %403 = vrot.lane.b32.xlu0 %v338_v38, %s1907_s27  ;;  %v688_v38 = vshrl.u32 %v2124_v27, 16 }
  0x38   : > { %660 = vrot.lane.b32.xlu1 %v644_v34, %s1907_s27  ;;  %424 = vrot.lane.b32.xlu0 %v2001_v14, %s1906_s26  ;;  %v445_v34 = vor.u32 %v444_v31, %v440_v30 }
  0x3a   : > { %v450_v36 = vsel %vm302_vm0, %v445_v34, %v449_v35 }
  0x3c   : > { %662 = vrot.lane.b32.xlu1 %v646_v48, %s1907_s27  ;;  %455 = vrot.lane.b32.xlu0 %v350_v39, %s1908_s28  ;;  %v979_v39 = vshll.u32 %v1861_v37, 16 }
  0x3e   : > { %v981_v45 = vrot.slane %v979_v39, 1 }
  0x40   : > { %678 = vrot.lane.b32.xlu1 %v2042_v42, %s1906_s26  ;;  %457 = vrot.lane.b32.xlu0 %v362_v56, %s1908_s28  ;;  %v982_v47 = vor.u32 %v981_v45, %v977_v43 }
  0x44   : > { %696 = vrot.lane.b32.xlu1 %v648_v57, %s1908_s28  ;;  %676 = vrot.lane.b32.xlu0 %v2011_v23, %s1906_s26 }
  0x48   : > { %409 = vrot.lane.b32.xlu1 %v374_v60, %s1907_s27  ;;  %694 = vrot.lane.b32.xlu0 %v646_v48, %s1908_s28  ;;  %v986_v48 = vrot.slane %v984_v46, 1 }
  0x4a   : > { %v987_v51 = vsel %vm302_vm0, %v982_v47, %v986_v48 }
  0x4c   : > { %430 = vrot.lane.b32.xlu1 %v2076_v61, %s1906_s26  ;;  %407 = vrot.lane.b32.xlu0 %v362_v56, %s1907_s27 }
  0x50   : > { %664 = vrot.lane.b32.xlu1 %v648_v57, %s1907_s27  ;;  %428 = vrot.lane.b32.xlu0 %v2048_v44, %s1906_s26 }
  0x54   : > { %666 = vrot.lane.b32.xlu1 %v650_v9, %s1907_s27  ;;  %459 = vrot.lane.b32.xlu0 %v374_v60, %s1908_s28 }
  0x58   : > { %682 = vrot.lane.b32.xlu1 %v2080_v62, %s1906_s26  ;;  %461 = vrot.lane.b32.xlu0 %v386_v18, %s1908_s28 }
  0x5c   : > { %700 = vrot.lane.b32.xlu1 %v652_v20, %s1908_s28  ;;  %680 = vrot.lane.b32.xlu0 %v2056_v49, %s1906_s26 }
  0x60   : > { %413 = vrot.lane.b32.xlu1 %v398_v25, %s1907_s27  ;;  %698 = vrot.lane.b32.xlu0 %v650_v9, %s1908_s28 }
  0x64   : > { %434 = vrot.lane.b32.xlu1 %v2120_v26, %s1906_s26  ;;  %411 = vrot.lane.b32.xlu0 %v386_v18, %s1907_s27 }
  0x68   : > { %668 = vrot.lane.b32.xlu1 %v652_v20, %s1907_s27  ;;  %432 = vrot.lane.b32.xlu0 %v2086_v5, %s1906_s26 }
  0x6c   : > { %670 = vrot.lane.b32.xlu1 %v654_v33, %s1907_s27  ;;  %463 = vrot.lane.b32.xlu0 %v398_v25, %s1908_s28 }
  0x70   : > { %686 = vrot.lane.b32.xlu1 %v2124_v27, %s1906_s26  ;;  %465 = vrot.lane.b32.xlu0 %v450_v36, %s1908_s28 }
  0x74   : > { %704 = vrot.lane.b32.xlu1 %v688_v38, %s1908_s28  ;;  %684 = vrot.lane.b32.xlu0 %v2094_v10, %s1906_s26 }
  0x78   : > { %971 = vrot.lane.b32.xlu1 %v1861_v37, %s1906_s26  ;;  %702 = vrot.lane.b32.xlu0 %v654_v33, %s1908_s28 }
  0x7c   : > { %1104 = vrot.lane.b32.xlu1 %v688_v38, %s1907_s27  ;;  %964 = vrot.lane.b32.xlu0 %v450_v36, %s1907_s27 }
  0x80   : > { %1110 = vrot.lane.b32.xlu1 %v1108_v50, %s1908_s28  ;;  %988 = vrot.lane.b32.xlu0 %v987_v51, %s1908_s28 }
  0x84   : > { %1106 = vrot.lane.b32.xlu0 %v1863_v40, %s1906_s26 }
  0x8a   : > { %v421_v52 = vpop.permute.xlu1 %420  ;;  %v673_v53 = vpop.permute.xlu0 %672 }
  0x8e   : > { %v423_v54 = vpop.permute.xlu1 %422 }
  0x92   : > { %v657_v55 = vpop.permute.xlu1 %656  ;;  %v400_v56 = vpop.permute.xlu0 %399 }
  0x93   : > { %v469_v59 = vsel %vm467_vm1, %v1986_v3, %v400_v56 }
  0x94   : > { %v486_v7 = vsel %vm484_vm2, %v469_v59, %v421_v52 }
  0x96   : > { %v659_v57 = vpop.permute.xlu1 %658  ;;  %v402_v58 = vpop.permute.xlu0 %401 }
  0x97   : > { %v709_v63 = vsel %vm467_vm1, %v1976_v1, %v659_v57  ;;  %v471_v8 = vsel %vm467_vm1, %v1973_v0, %v402_v58  ;;  %v707_v1 = vsel %vm467_vm1, %v1989_v4, %v657_v55 }
  0x98   : > { %v488_v13 = vsel %vm484_vm2, %v471_v8, %v423_v54  ;;  %v723_v25 = vsel %vm484_vm2, %v707_v1, %v673_v53 }
  0x9a   : > { %v675_v60 = vpop.permute.xlu1 %674  ;;  %v452_v6 = vpop.permute.xlu0 %451 }
  0x9b   : > { %v503_v9 = vsel %vm501_vm3, %v486_v7, %v452_v6  ;;  %v725_v3 = vsel %vm484_vm2, %v709_v63, %v675_v60 }
  0x9c   : > { %1725 = vmatprep.mubr.msk.bf16.mxu0 %vm526_vm4, %v503_v9  ;;  %v756_v12 = vshll.u32 %v503_v9, 16  ;;  %v754_v31 = vshrl.u32 %v503_v9, 16 }
  0x9e   : > { %v693_v11 = vpop.permute.xlu1 %692  ;;  %v454_v15 = vpop.permute.xlu0 %453  ;;  %v758_v21 = vrot.slane %v756_v12, 1 }
  0x9f   : > { %v741_v16 = vsel %vm501_vm3, %v725_v3, %v693_v11  ;;  %v2177_v17 = vsel %vm501_vm3, %v488_v13, %v454_v15 }
  0xa0   : > { %v766_v0 = vshll.u32 %v2177_v17, 16  ;;  %1726 = vmatmul.mubr.msk.bf16.vlgmr.msra.gmra.mrb[0].mxu0 %vm526_vm4, %v2177_v17  ;;  %v770_v20 = vshll.u32 %v741_v16, 16  ;;  %v764_v30 = vshrl.u32 %v2177_v17, 16  ;;  %v759_v38 = vor.u32 %v758_v21, %v754_v31 }
  0xa1   : > { %1760 = vmatpush3.bf16.msra.mxu0 %v2111_v24 }
  0xa2   : > { %v406_v18 = vpop.permute.xlu1 %405  ;;  %v768_v22 = vrot.slane %v766_v0, 1  ;;  %v691_v28 = vpop.permute.xlu0 %690  ;;  %v772_v35 = vrot.slane %v770_v20, 1 }
  0xa3   : > { %v739_v4 = vsel %vm501_vm3, %v723_v25, %v691_v28  ;;  %v475_v50 = vsel %vm467_vm1, %v2001_v14, %v406_v18 }
  0xa4   : > { %v760_v32 = vshll.u32 %v739_v4, 16  ;;  %v769_v34 = vor.u32 %v768_v22, %v764_v30 }
  0xa6   : > { %v427_v33 = vpop.permute.xlu1 %426  ;;  %v762_v36 = vrot.slane %v760_v32, 1  ;;  %v404_v37 = vpop.permute.xlu0 %403  ;;  %v2189_v40 = vsel %vm302_vm0, %v769_v34, %v772_v35 }
  0xa7   : > { %v473_v46 = vsel %vm467_vm1, %v1979_v2, %v404_v37  ;;  %v492_v53 = vsel %vm484_vm2, %v475_v50, %v427_v33 }
  0xa8   : > { %v763_v39 = vsel %vm302_vm0, %v759_v38, %v762_v36 }
  0xa9   : > { %1743 = vmatprep.mubr.msk.bf16.mxu1 %vm526_vm4, %v763_v39 }
  0xaa   : > { %v661_v24 = vpop.permute.xlu1 %660  ;;  %1744 = vmatmul.mubr.msk.bf16.vlgmr.msra.gmra.mrb[0].mxu1 %vm526_vm4, %v2189_v40  ;;  %v425_v43 = vpop.permute.xlu0 %424 }
  0xab   : > { %1778 = vmatpush3.bf16.msra.mxu1 %v2133_v29  ;;  %v490_v47 = vsel %vm484_vm2, %v473_v46, %v425_v43 }
  0xae   : > { %v663_v45 = vpop.permute.xlu1 %662  ;;  %v456_v48 = vpop.permute.xlu0 %455 }
  0xaf   : > { %v2200_v51 = vsel %vm501_vm3, %v490_v47, %v456_v48  ;;  %v713_v29 = vsel %vm467_vm1, %v2011_v23, %v663_v45  ;;  %v711_v23 = vsel %vm467_vm1, %v2004_v19, %v661_v24 }
  0xb0   : > { %1729 = vmatprep.mubr.msk.bf16.mxu0 %vm526_vm4, %v2200_v51  ;;  %v776_v56 = vshll.u32 %v2200_v51, 16  ;;  %v774_v3 = vshrl.u32 %v2200_v51, 16 }
  0xb2   : > { %v679_v52 = vpop.permute.xlu1 %678  ;;  %v458_v54 = vpop.permute.xlu0 %457  ;;  %v778_v6 = vrot.slane %v776_v56, 1 }
  0xb3   : > { %v2208_v2 = vsel %vm501_vm3, %v492_v53, %v458_v54  ;;  %v729_v55 = vsel %vm484_vm2, %v713_v29, %v679_v52 }
  0xb4   : > { %1730 = vmatmul.mubr.msk.bf16.gmra.mrb[4].mxu0 %vm526_vm4, %v2208_v2  ;;  %v786_v59 = vshll.u32 %v2208_v2, 16  ;;  %v784_v15 = vshrl.u32 %v2208_v2, 16  ;;  %v779_v1 = vor.u32 %v778_v6, %v774_v3 }
  0xb6   : > { %v697_v14 = vpop.permute.xlu1 %696  ;;  %v677_v57 = vpop.permute.xlu0 %676  ;;  %v788_v9 = vrot.slane %v786_v59, 1 }
  0xb7   : > { %v745_v58 = vsel %vm501_vm3, %v729_v55, %v697_v14  ;;  %v727_v7 = vsel %vm484_vm2, %v711_v23, %v677_v57 }
  0xb8   : > { %v790_v63 = vshll.u32 %v745_v58, 16  ;;  %v789_v20 = vor.u32 %v788_v9, %v784_v15 }
  0xba   : > { %v410_v60 = vpop.permute.xlu1 %409  ;;  %v695_v8 = vpop.permute.xlu0 %694  ;;  %v792_v16 = vrot.slane %v790_v63, 1 }
  0xbb   : > { %v743_v11 = vsel %vm501_vm3, %v727_v7, %v695_v8  ;;  %v479_v32 = vsel %vm467_vm1, %v2048_v44, %v410_v60 }
  0xbc   : > { %v780_v12 = vshll.u32 %v743_v11, 16  ;;  %v2228_v22 = vsel %vm302_vm0, %v789_v20, %v792_v16 }
  0xbe   : > { %v431_v13 = vpop.permute.xlu1 %430  ;;  %v782_v0 = vrot.slane %v780_v12, 1  ;;  %v408_v18 = vpop.permute.xlu0 %407 }
  0xbf   : > { %v477_v30 = vsel %vm467_vm1, %v2038_v41, %v408_v18  ;;  %v496_v35 = vsel %vm484_vm2, %v479_v32, %v431_v13 }
  0xc0   : > { %v2223_v19 = vsel %vm302_vm0, %v779_v1, %v782_v0 }
  0xc1   : > { %1747 = vmatprep.mubr.msk.bf16.mxu1 %vm526_vm4, %v2223_v19 }
  0xc2   : > { %v665_v21 = vpop.permute.xlu1 %664  ;;  %1748 = vmatmul.mubr.msk.bf16.gmra.mrb[4].mxu1 %vm526_vm4, %v2228_v22  ;;  %v429_v25 = vpop.permute.xlu0 %428 }
  0xc3   : > { %v494_v4 = vsel %vm484_vm2, %v477_v30, %v429_v25 }
  0xc6   : > { %v667_v28 = vpop.permute.xlu1 %666  ;;  %v460_v31 = vpop.permute.xlu0 %459 }
  0xc7   : > { %v2238_v33 = vsel %vm501_vm3, %v494_v4, %v460_v31  ;;  %v717_v36 = vsel %vm467_vm1, %v2056_v49, %v667_v28  ;;  %v715_v49 = vsel %vm467_vm1, %v2042_v42, %v665_v21 }
  0xc8   : > { %1733 = vmatprep.mubr.msk.bf16.mxu0 %vm526_vm4, %v2238_v33  ;;  %v796_v39 = vshll.u32 %v2238_v33, 16  ;;  %v794_v54 = vshrl.u32 %v2238_v33, 16 }
  0xca   : > { %v683_v34 = vpop.permute.xlu1 %682  ;;  %v462_v37 = vpop.permute.xlu0 %461  ;;  %v798_v48 = vrot.slane %v796_v39, 1 }
  0xcb   : > { %v2246_v41 = vsel %vm501_vm3, %v496_v35, %v462_v37  ;;  %v733_v38 = vsel %vm484_vm2, %v717_v36, %v683_v34 }
  0xcc   : > { %1734 = vmatmul.mubr.msk.bf16.gmra.mrb[8].mxu0 %vm526_vm4, %v2246_v41  ;;  %v806_v45 = vshll.u32 %v2246_v41, 16  ;;  %v804_v56 = vshrl.u32 %v2246_v41, 16  ;;  %v799_v58 = vor.u32 %v798_v48, %v794_v54 }
  0xce   : > { %v701_v44 = vpop.permute.xlu1 %700  ;;  %v681_v24 = vpop.permute.xlu0 %680  ;;  %v808_v53 = vrot.slane %v806_v45, 1 }
  0xcf   : > { %v749_v43 = vsel %vm501_vm3, %v733_v38, %v701_v44  ;;  %v731_v50 = vsel %vm484_vm2, %v715_v49, %v681_v24 }
  0xd0   : > { %v810_v47 = vshll.u32 %v749_v43, 16  ;;  %v809_v23 = vor.u32 %v808_v53, %v804_v56 }
  0xd2   : > { %v414_v46 = vpop.permute.xlu1 %413  ;;  %v699_v52 = vpop.permute.xlu0 %698  ;;  %v812_v57 = vrot.slane %v810_v47, 1 }
  0xd3   : > { %v747_v29 = vsel %vm501_vm3, %v731_v50, %v699_v52  ;;  %v483_v12 = vsel %vm467_vm1, %v2086_v5, %v414_v46 }
  0xd4   : > { %v800_v14 = vshll.u32 %v747_v29, 16  ;;  %v813_v6 = vsel %vm302_vm0, %v809_v23, %v812_v57 }
  0xd6   : > { %v435_v55 = vpop.permute.xlu1 %434  ;;  %v802_v59 = vrot.slane %v800_v14, 1  ;;  %v412_v60 = vpop.permute.xlu0 %411 }
  0xd7   : > { %v481_v9 = vsel %vm467_vm1, %v2076_v61, %v412_v60  ;;  %v500_v16 = vsel %vm484_vm2, %v483_v12, %v435_v55 }
  0xd8   : > { %v2261_v42 = vsel %vm302_vm0, %v799_v58, %v802_v59 }
  0xd9   : > { %1751 = vmatprep.mubr.msk.bf16.mxu1 %vm526_vm4, %v2261_v42 }
  0xda   : > { %v669_v63 = vpop.permute.xlu1 %668  ;;  %1752 = vmatmul.mubr.msk.bf16.gmra.mrb[8].mxu1 %vm526_vm4, %v813_v6  ;;  %v433_v7 = vpop.permute.xlu0 %432 }
  0xdb   : > { %v498_v11 = vsel %vm484_vm2, %v481_v9, %v433_v7  ;;  %v719_v30 = vsel %vm467_vm1, %v2080_v62, %v669_v63 }
  0xde   : > { %v671_v8 = vpop.permute.xlu1 %670  ;;  %v464_v3 = vpop.permute.xlu0 %463 }
  0xdf   : > { %v515_v13 = vsel %vm501_vm3, %v498_v11, %v464_v3  ;;  %v721_v1 = vsel %vm467_vm1, %v2094_v10, %v671_v8 }
  0xe0   : > { %1737 = vmatprep.mubr.msk.bf16.mxu0 %vm526_vm4, %v515_v13  ;;  %v816_v5 = vshll.u32 %v515_v13, 16  ;;  %v814_v36 = vshrl.u32 %v515_v13, 16 }
  0xe2   : > { %v687_v15 = vpop.permute.xlu1 %686  ;;  %v466_v0 = vpop.permute.xlu0 %465  ;;  %v818_v4 = vrot.slane %v816_v5, 1 }
  0xe3   : > { %v517_v18 = vsel %vm501_vm3, %v500_v16, %v466_v0  ;;  %v737_v20 = vsel %vm484_vm2, %v721_v1, %v687_v15 }
  0xe4   : > { %1738 = vmatmul.mubr.msk.bf16.gmra.mrb[12].mxu0 %vm526_vm4, %v517_v18  ;;  %v826_v28 = vshll.u32 %v517_v18, 16  ;;  %v819_v38 = vor.u32 %v818_v4, %v814_v36 }
  0xe5   : > { %1761 = vmatprep.mubr.msk.bf16.mxu0 %vm526_vm4, %v2177_v17  ;;  %v824_v17 = vshrl.u32 %v517_v18, 16 }
  0xe6   : > { %v705_v61 = vpop.permute.xlu1 %704  ;;  %v685_v21 = vpop.permute.xlu0 %684  ;;  %v828_v34 = vrot.slane %v826_v28, 1 }
  0xe7   : > { %v753_v25 = vsel %vm501_vm3, %v737_v20, %v705_v61  ;;  %v735_v31 = vsel %vm484_vm2, %v719_v30, %v685_v21 }
  0xe8   : > { %v830_v10 = vshll.u32 %v753_v25, 16  ;;  %v829_v39 = vor.u32 %v828_v34, %v824_v17 }
  0xea   : > { %v703_v32 = vpop.permute.xlu0 %702  ;;  %v832_v44 = vrot.slane %v830_v10, 1 }
  0xeb   : > { %v751_v35 = vsel %vm501_vm3, %v735_v31, %v703_v32 }
  0xec   : > { %v820_v37 = vshll.u32 %v751_v35, 16  ;;  %1762 = vmatmul.mubr.msk.bf16.vlgmr.msra.gmra.mrb[16].mxu0 %vm526_vm4, %v2200_v51  ;;  %v833_v43 = vsel %vm302_vm0, %v829_v39, %v832_v44  ;;  %v972_v51 = vpop.permute.xlu1 %971 }
  0xed   : > { %1765 = vmatprep.mubr.msk.bf16.mxu0 %vm526_vm4, %v2208_v2 }
  0xee   : > { %v822_v62 = vrot.slane %v820_v37, 1  ;;  %v965_v45 = vpop.permute.xlu0 %964 }
  0xef   : > { %v991_v46 = vsel %vm467_vm1, %v2120_v26, %v965_v45 }
  0xf0   : > { %v823_v24 = vsel %vm302_vm0, %v819_v38, %v822_v62  ;;  %v1105_v49 = vpop.permute.xlu1 %1104 }
  0xf1   : > { %1755 = vmatprep.mubr.msk.bf16.mxu1 %vm526_vm4, %v823_v24 }
  0xf2   : > { %1756 = vmatmul.mubr.msk.bf16.gmra.mrb[12].mxu1 %vm526_vm4, %v833_v43  ;;  %v989_v2 = vpop.permute.xlu0 %988 }
  0xf3   : > { %1779 = vmatprep.mubr.msk.bf16.mxu1 %vm526_vm4, %v2189_v40  ;;  %v993_v40 = vsel %vm484_vm2, %v991_v46, %v972_v51 }
  0xf4   : > { %1766 = vmatmul.mubr.msk.bf16.gmra.mrb[20].mxu0 %vm526_vm4, %v2238_v33  ;;  %v1113_v33 = vsel %vm467_vm1, %v2124_v27, %v1105_v49  ;;  %v995_v47 = vsel %vm501_vm3, %v993_v40, %v989_v2  ;;  %v1111_v48 = vpop.permute.xlu1 %1110 }
  0xf5   : > { %1769 = vmatprep.mubr.msk.bf16.mxu0 %vm526_vm4, %v2246_v41  ;;  %v1120_v26 = vshll.u32 %v995_v47, 16  ;;  %v1118_v50 = vshrl.u32 %v995_v47, 16 }
  0xf6   : > { %v1107_v41 = vpop.permute.xlu0 %1106 }
  0xf7   : > { %v1122_v52 = vrot.slane %v1120_v26, 1 }
  0xf9   : > { %v1123_v27 = vor.u32 %v1122_v52, %v1118_v50 }
  0xfa   : > { %1780 = vmatmul.mubr.msk.bf16.vlgmr.msra.gmra.mrb[16].mxu1 %vm526_vm4, %v2223_v19  ;;  %v1115_v19 = vsel %vm484_vm2, %v1113_v33, %v1107_v41 }
  0xfb   : > { %1783 = vmatprep.mubr.msk.bf16.mxu1 %vm526_vm4, %v2228_v22  ;;  %v1117_v22 = vsel %vm501_vm3, %v1115_v19, %v1111_v48 }
  0xfc   : > { %1770 = vmatmul.mubr.msk.bf16.gmra.mrb[24].mxu0 %vm526_vm4, %v515_v13  ;;  %v1124_v53 = vshll.u32 %v1117_v22, 16 }
  0xfd   : > { %1773 = vmatprep.mubr.msk.bf16.mxu0 %vm526_vm4, %v517_v18 }
  0xfe   : > { %v1126_v29 = vrot.slane %v1124_v53, 1 }
 0x100   : > { %v1127_v54 = vsel %vm302_vm0, %v1123_v27, %v1126_v29 }
 0x102   : > { %1784 = vmatmul.mubr.msk.bf16.gmra.mrb[20].mxu1 %vm526_vm4, %v2261_v42 }
 0x103   : > { %1787 = vmatprep.mubr.msk.bf16.mxu1 %vm526_vm4, %v813_v6 }
 0x104   : > { %1774 = vmatmul.mubr.msk.bf16.gmra.mrb[28].mxu0 %vm526_vm4, %v995_v47 }
 0x10a   : > { %1788 = vmatmul.mubr.msk.bf16.gmra.mrb[24].mxu1 %vm526_vm4, %v823_v24 }
 0x10b   : > { %1791 = vmatprep.mubr.msk.bf16.mxu1 %vm526_vm4, %v833_v43 }
 0x112   : > { %1792 = vmatmul.mubr.msk.bf16.gmra.mrb[28].mxu1 %vm526_vm4, %v1127_v54 }
 0x173   : > { %v2323_v14 = vpop.f32.mrb[0].mxu0 }
 0x174   : > { %v2325_v55 = vpop.f32.mrb[1].mxu0 }
 0x175   : > { %v2327_v56 = vpop.f32.mrb[2].mxu0 }
 0x176   : > { %v2329_v57 = vpop.f32.mrb[3].mxu0 }
 0x17d   : > { %v1745_v58 = vpop.f32.mrb[0].mxu1 }
 0x17e   : > { %1257 = vrot.lane.b32.xlu0 %v1745_v58, %s1906_s26  ;;  %v901_v59 = vpop.f32.mrb[1].mxu1 }
 0x17f   : > { %v1746_v60 = vpop.f32.mrb[2].mxu1 }
 0x180   : > { %1259 = vrot.lane.b32.xlu1 %v1746_v60, %s1906_s26  ;;  %v904_v23 = vpop.f32.mrb[3].mxu1 }
 0x182   : > { %1253 = vrot.lane.b32.xlu0 %v901_v59, %s1906_s26 }
 0x184   : > { %1255 = vrot.lane.b32.xlu1 %v904_v23, %s1906_s26 }
 0x187   : > { %v2335_v42 = vpop.f32.mrb[4].mxu0 }
 0x188   : > { %v2337_v63 = vpop.f32.mrb[5].mxu0 }
 0x189   : > { %v2339_v6 = vpop.f32.mrb[6].mxu0 }
 0x18a   : > { %v2341_v7 = vpop.f32.mrb[7].mxu0 }
 0x195   : > { %v1749_v8 = vpop.f32.mrb[4].mxu1 }
 0x196   : > { %1265 = vrot.lane.b32.xlu0 %v1749_v8, %s1906_s26  ;;  %v917_v9 = vpop.f32.mrb[5].mxu1 }
 0x197   : > { %v1750_v11 = vpop.f32.mrb[6].mxu1 }
 0x198   : > { %1267 = vrot.lane.b32.xlu1 %v1750_v11, %s1906_s26  ;;  %v920_v3 = vpop.f32.mrb[7].mxu1 }
 0x19a   : > { %1261 = vrot.lane.b32.xlu0 %v917_v9, %s1906_s26 }
 0x19c   : > { %1263 = vrot.lane.b32.xlu1 %v920_v3, %s1906_s26 }
 0x19f   : > { %v2347_v12 = vpop.f32.mrb[8].mxu0 }
 0x1a0   : > { %v2349_v13 = vpop.f32.mrb[9].mxu0 }
 0x1a1   : > { %v2351_v15 = vpop.f32.mrb[10].mxu0 }
 0x1a2   : > { %v2353_v16 = vpop.f32.mrb[11].mxu0 }
 0x1ad   : > { %v1753_v1 = vpop.f32.mrb[8].mxu1 }
 0x1ae   : > { %1273 = vrot.lane.b32.xlu0 %v1753_v1, %s1906_s26  ;;  %v933_v0 = vpop.f32.mrb[9].mxu1 }
 0x1af   : > { %v1754_v18 = vpop.f32.mrb[10].mxu1 }
 0x1b0   : > { %1275 = vrot.lane.b32.xlu1 %v1754_v18, %s1906_s26  ;;  %v936_v61 = vpop.f32.mrb[11].mxu1 }
 0x1b2   : > { %1269 = vrot.lane.b32.xlu0 %v933_v0, %s1906_s26 }
 0x1b4   : > { %1271 = vrot.lane.b32.xlu1 %v936_v61, %s1906_s26 }
 0x1b7   : > { %v2359_v20 = vpop.f32.mrb[12].mxu0 }
 0x1b8   : > { %v2361_v5 = vpop.f32.mrb[13].mxu0 }
 0x1b9   : > { %v2363_v21 = vpop.f32.mrb[14].mxu0 }
 0x1ba   : > { %v2365_v25 = vpop.f32.mrb[15].mxu0 }
 0x1bf   : > { %v1763_v28 = vpop.f32.mrb[16].mxu0 }
 0x1c0   : > { %v1041_v30 = vpop.f32.mrb[17].mxu0 }
 0x1c1   : > { %v1764_v10 = vpop.f32.mrb[18].mxu0 }
 0x1c2   : > { %v1044_v4 = vpop.f32.mrb[19].mxu0 }
 0x1c5   : > { %v1757_v31 = vpop.f32.mrb[12].mxu1 }
 0x1c6   : > { %1281 = vrot.lane.b32.xlu0 %v1757_v31, %s1906_s26  ;;  %v949_v32 = vpop.f32.mrb[13].mxu1 }
 0x1c7   : > { %v1758_v34 = vpop.f32.mrb[14].mxu1  ;;  %v1767_v35 = vpop.f32.mrb[20].mxu0 }
 0x1c8   : > { %v1057_v36 = vpop.f32.mrb[21].mxu0  ;;  %1283 = vrot.lane.b32.xlu1 %v1758_v34, %s1906_s26  ;;  %v952_v37 = vpop.f32.mrb[15].mxu1 }
 0x1c9   : > { %v1768_v17 = vpop.f32.mrb[22].mxu0 }
 0x1ca   : > { %v1060_v44 = vpop.f32.mrb[23].mxu0  ;;  %1277 = vrot.lane.b32.xlu0 %v949_v32, %s1906_s26 }
 0x1cc   : > { %1279 = vrot.lane.b32.xlu1 %v952_v37, %s1906_s26 }
 0x1cd   : > { %v1781_v38 = vpop.f32.mrb[16].mxu1 }
 0x1ce   : > { %1321 = vrot.lane.b32.xlu0 %v1763_v28, %s1909_s10  ;;  %v1174_v62 = vpop.f32.mrb[17].mxu1 }
 0x1cf   : > { %v1771_v39 = vpop.f32.mrb[24].mxu0  ;;  %v1782_v24 = vpop.f32.mrb[18].mxu1 }
 0x1d0   : > { %v1073_v43 = vpop.f32.mrb[25].mxu0  ;;  %1323 = vrot.lane.b32.xlu1 %v1764_v10, %s1909_s10  ;;  %v1177_v45 = vpop.f32.mrb[19].mxu1 }
 0x1d1   : > { %v1772_v51 = vpop.f32.mrb[26].mxu0 }
 0x1d2   : > { %v1076_v2 = vpop.f32.mrb[27].mxu0  ;;  %1317 = vrot.lane.b32.xlu0 %v1041_v30, %s1909_s10 }
 0x1d4   : > { %1319 = vrot.lane.b32.xlu1 %v1044_v4, %s1909_s10 }
 0x1d5   : > { %v1785_v46 = vpop.f32.mrb[20].mxu1 }
 0x1d6   : > { %1385 = vrot.lane.b32.xlu0 %v1781_v38, %s1910_s11  ;;  %v1190_v49 = vpop.f32.mrb[21].mxu1 }
 0x1d7   : > { %v1786_v40 = vpop.f32.mrb[22].mxu1  ;;  %v1775_v33 = vpop.f32.mrb[28].mxu0 }
 0x1d8   : > { %1387 = vrot.lane.b32.xlu1 %v1782_v24, %s1910_s11  ;;  %v1193_v41 = vpop.f32.mrb[23].mxu1  ;;  %v1089_v47 = vpop.f32.mrb[29].mxu0 }
 0x1d9   : > { %v1776_v19 = vpop.f32.mrb[30].mxu0 }
 0x1da   : > { %1329 = vrot.lane.b32.xlu0 %v1767_v35, %s1909_s10  ;;  %v1092_v48 = vpop.f32.mrb[31].mxu0 }
 0x1dc   : > { %1331 = vrot.lane.b32.xlu1 %v1768_v17, %s1909_s10 }
 0x1dd   : > { %v1789_v26 = vpop.f32.mrb[24].mxu1 }
 0x1de   : > { %1381 = vrot.lane.b32.xlu0 %v1174_v62, %s1910_s11  ;;  %v1206_v22 = vpop.f32.mrb[25].mxu1 }
 0x1df   : > { %v1790_v50 = vpop.f32.mrb[26].mxu1 }
 0x1e0   : > { %1383 = vrot.lane.b32.xlu1 %v1177_v45, %s1910_s11  ;;  %v1209_v52 = vpop.f32.mrb[27].mxu1 }
 0x1e2   : > { %1325 = vrot.lane.b32.xlu0 %v1057_v36, %s1909_s10 }
 0x1e4   : > { %1327 = vrot.lane.b32.xlu1 %v1060_v44, %s1909_s10 }
 0x1e5   : > { %v1793_v53 = vpop.f32.mrb[28].mxu1 }
 0x1e6   : > { %1393 = vrot.lane.b32.xlu0 %v1785_v46, %s1910_s11  ;;  %v1222_v27 = vpop.f32.mrb[29].mxu1 }
 0x1e7   : > { %v1794_v29 = vpop.f32.mrb[30].mxu1 }
 0x1e8   : > { %1395 = vrot.lane.b32.xlu1 %v1786_v40, %s1910_s11  ;;  %v1225_v54 = vpop.f32.mrb[31].mxu1 }
 0x1ea   : > { %1337 = vrot.lane.b32.xlu0 %v1771_v39, %s1909_s10 }
 0x1ec   : > { %1339 = vrot.lane.b32.xlu1 %v1772_v51, %s1909_s10 }
 0x1ee   : > { %1389 = vrot.lane.b32.xlu0 %v1190_v49, %s1910_s11 }
 0x1f0   : > { %1391 = vrot.lane.b32.xlu1 %v1193_v41, %s1910_s11  ;;  %v1258_v58 = vpop.permute.xlu0 %1257 }
 0x1f2   : > { %1333 = vrot.lane.b32.xlu0 %v1073_v43, %s1909_s10  ;;  %v1260_v59 = vpop.permute.xlu1 %1259 }
 0x1f3   : > { %v1432_v38 = vsel %vm484_vm2, %v2327_v56, %v1260_v59 }
 0x1f4   : > { %1335 = vrot.lane.b32.xlu1 %v1076_v2, %s1909_s10  ;;  %v1254_v60 = vpop.permute.xlu0 %1253 }
 0x1f5   : > { %v1429_v2 = vsel %vm484_vm2, %v2325_v55, %v1254_v60 }
 0x1f6   : > { %1401 = vrot.lane.b32.xlu0 %v1789_v26, %s1910_s11  ;;  %v1256_v23 = vpop.permute.xlu1 %1255 }
 0x1f7   : > { %v1430_v40 = vsel %vm484_vm2, %v2329_v57, %v1256_v23 }
 0x1f8   : > { %1403 = vrot.lane.b32.xlu1 %v1790_v50, %s1910_s11 }
 0x1fa   : > { %1345 = vrot.lane.b32.xlu0 %v1775_v33, %s1909_s10 }
 0x1fc   : > { %1347 = vrot.lane.b32.xlu1 %v1776_v19, %s1909_s10 }
 0x1fe   : > { %1397 = vrot.lane.b32.xlu0 %v1206_v22, %s1910_s11 }
 0x200   : > { %1399 = vrot.lane.b32.xlu1 %v1209_v52, %s1910_s11 }
 0x202   : > { %1341 = vrot.lane.b32.xlu0 %v1089_v47, %s1909_s10 }
 0x204   : > { %1343 = vrot.lane.b32.xlu1 %v1092_v48, %s1909_s10 }
 0x206   : > { %1405 = vrot.lane.b32.xlu0 %v1222_v27, %s1910_s11 }
 0x208   : > { %1407 = vrot.lane.b32.xlu1 %v1225_v54, %s1910_s11  ;;  %v1266_v8 = vpop.permute.xlu0 %1265 }
 0x209   : > { %v1435_v57 = vsel %vm484_vm2, %v2335_v42, %v1266_v8 }
 0x20a   : > { %1409 = vrot.lane.b32.xlu0 %v1793_v53, %s1910_s11  ;;  %v1268_v9 = vpop.permute.xlu1 %1267 }
 0x20b   : > { %v1436_v53 = vsel %vm484_vm2, %v2339_v6, %v1268_v9 }
 0x20c   : > { %1411 = vrot.lane.b32.xlu1 %v1794_v29, %s1910_s11  ;;  %v2403_v11 = vpop.permute.xlu0 %1261 }
 0x20d   : > { %v1433_v6 = vsel %vm484_vm2, %v2337_v63, %v2403_v11 }
 0x20e   : > { %v2405_v3 = vpop.permute.xlu1 %1263 }
 0x220   : > { %v2407_v1 = vpop.permute.xlu0 %1273 }
 0x222   : > { %v2409_v0 = vpop.permute.xlu1 %1275 }
 0x224   : > { %v2411_v18 = vpop.permute.xlu0 %1269 }
 0x226   : > { %v2413_v61 = vpop.permute.xlu1 %1271 }
 0x238   : > { %v1282_v28 = vpop.permute.xlu0 %1281 }
 0x239   : > { %v2417_v30 = vsel %vm484_vm2, %v2359_v20, %v1282_v28  ;;  %v1431_v20 = vsel %vm484_vm2, %v2323_v14, %v1258_v58  ;;  %v1434_v28 = vsel %vm484_vm2, %v2341_v7, %v2405_v3  ;;  %v1439_v7 = vsel %vm484_vm2, %v2347_v12, %v2407_v1 }
 0x23a   : > { %v1284_v10 = vpop.permute.xlu1 %1283 }
 0x23b   : > { %v2421_v4 = vsel %vm484_vm2, %v2363_v21, %v1284_v10  ;;  %v2434_v21 = vld [vmem:[%s2574_s2] ss:$0 sm:$0xff] }
 0x23c   : > { %v2423_v31 = vpop.permute.xlu0 %1277 }
 0x23e   : > { %v2425_v32 = vpop.permute.xlu1 %1279 }
 0x240   : > { %v1322_v34 = vpop.permute.xlu0 %1321 }
 0x241   : > { %v1447_v17 = vsel %vm526_vm4, %v1431_v20, %v1322_v34 }
 0x242   : > { %v1324_v35 = vpop.permute.xlu1 %1323 }
 0x243   : > { %v1448_v62 = vsel %vm526_vm4, %v1432_v38, %v1324_v35 }
 0x244   : > { %v1318_v36 = vpop.permute.xlu0 %1317 }
 0x245   : > { %v1445_v46 = vsel %vm526_vm4, %v1429_v2, %v1318_v36 }
 0x246   : > { %v1320_v37 = vpop.permute.xlu1 %1319 }
 0x247   : > { %v1446_v41 = vsel %vm526_vm4, %v1430_v40, %v1320_v37 }
 0x248   : > { %v1386_v44 = vpop.permute.xlu0 %1385 }
 0x249   : > { %v1464_v14 = vsel %vm1461_vm5, %v1447_v17, %v1386_v44  ;;  %v1440_v44 = vsel %vm484_vm2, %v2351_v15, %v2409_v0  ;;  %v1437_v15 = vsel %vm484_vm2, %v2349_v13, %v2411_v18 }
 0x24a   : > { %v1487_v39 = vadd.f32 %v2434_v21, %v1464_v14  ;;  %v1388_v24 = vpop.permute.xlu1 %1387 }
 0x24b   : > { %v1465_v43 = vsel %vm1461_vm5, %v1448_v62, %v1388_v24 }
 0x24c   : > { %1504 = vst.msk [vmem:[%s2442_s25 + $0x10] sm:$0xff] %vm1501_vm6, %v1487_v39  ;;  %v1488_v56 = vadd.f32 %v2434_v21, %v1465_v43  ;;  %v1330_v45 = vpop.permute.xlu0 %1329 }
 0x24d   : > { %v1451_v50 = vsel %vm526_vm4, %v1435_v57, %v1330_v45  ;;  %v1438_v45 = vsel %vm484_vm2, %v2353_v16, %v2413_v61  ;;  %v1441_v16 = vsel %vm484_vm2, %v2361_v5, %v2423_v31 }
 0x24e   : > { %1505 = vst.msk [vmem:[%s2442_s25 + $0x18] sm:$0xff] %vm1501_vm6, %v1488_v56  ;;  %v1332_v51 = vpop.permute.xlu1 %1331 }
 0x24f   : > { %v1452_v29 = vsel %vm526_vm4, %v1436_v53, %v1332_v51 }
 0x250   : > { %v1382_v49 = vpop.permute.xlu0 %1381 }
 0x251   : > { %v1462_v33 = vsel %vm1461_vm5, %v1445_v46, %v1382_v49 }
 0x252   : > { %v1485_v47 = vadd.f32 %v2434_v21, %v1462_v33  ;;  %v1384_v19 = vpop.permute.xlu1 %1383 }
 0x253   : > { %v1463_v48 = vsel %vm1461_vm5, %v1446_v41, %v1384_v19 }
 0x254   : > { %1502 = vst.msk [vmem:[%s2442_s25] sm:$0xff] %vm1501_vm6, %v1485_v47  ;;  %v1486_v55 = vadd.f32 %v2434_v21, %v1463_v48  ;;  %v1326_v26 = vpop.permute.xlu0 %1325  ;;  %v1442_v47 = vsel %vm484_vm2, %v2365_v25, %v2425_v32 }
 0x255   : > { %v1449_v8 = vsel %vm526_vm4, %v1433_v6, %v1326_v26 }
 0x256   : > { %1503 = vst.msk [vmem:[%s2442_s25 + $0x8] sm:$0xff] %vm1501_vm6, %v1486_v55  ;;  %v1328_v22 = vpop.permute.xlu1 %1327 }
 0x257   : > { %v1450_v34 = vsel %vm526_vm4, %v1434_v28, %v1328_v22 }
 0x258   : > { %v1394_v52 = vpop.permute.xlu0 %1393 }
 0x259   : > { %v1468_v27 = vsel %vm1461_vm5, %v1451_v50, %v1394_v52 }
 0x25a   : > { %v1491_v54 = vadd.f32 %v2434_v21, %v1468_v27  ;;  %v1396_v58 = vpop.permute.xlu1 %1395 }
 0x25b   : > { %v1469_v59 = vsel %vm1461_vm5, %v1452_v29, %v1396_v58 }
 0x25c   : > { %1508 = vst.msk [vmem:[%s2442_s25 + $0x30] sm:$0xff] %vm1501_vm6, %v1491_v54  ;;  %v1492_v42 = vadd.f32 %v2434_v21, %v1469_v59  ;;  %v1338_v60 = vpop.permute.xlu0 %1337 }
 0x25d   : > { %v1455_v3 = vsel %vm526_vm4, %v1439_v7, %v1338_v60 }
 0x25e   : > { %1509 = vst.msk [vmem:[%s2442_s25 + $0x38] sm:$0xff] %vm1501_vm6, %v1492_v42  ;;  %v1340_v23 = vpop.permute.xlu1 %1339 }
 0x25f   : > { %v1456_v14 = vsel %vm526_vm4, %v1440_v44, %v1340_v23 }
 0x260   : > { %v1390_v9 = vpop.permute.xlu0 %1389 }
 0x261   : > { %v1466_v10 = vsel %vm1461_vm5, %v1449_v8, %v1390_v9 }
 0x262   : > { %v1489_v35 = vadd.f32 %v2434_v21, %v1466_v10  ;;  %v1392_v36 = vpop.permute.xlu1 %1391 }
 0x263   : > { %v1467_v37 = vsel %vm1461_vm5, %v1450_v34, %v1392_v36 }
 0x264   : > { %1506 = vst.msk [vmem:[%s2442_s25 + $0x20] sm:$0xff] %vm1501_vm6, %v1489_v35  ;;  %v1490_v63 = vadd.f32 %v2434_v21, %v1467_v37  ;;  %v1334_v11 = vpop.permute.xlu0 %1333 }
 0x265   : > { %v1453_v0 = vsel %vm526_vm4, %v1437_v15, %v1334_v11 }
 0x266   : > { %1507 = vst.msk [vmem:[%s2442_s25 + $0x28] sm:$0xff] %vm1501_vm6, %v1490_v63  ;;  %v1336_v20 = vpop.permute.xlu1 %1335 }
 0x267   : > { %v1454_v2 = vsel %vm526_vm4, %v1438_v45, %v1336_v20 }
 0x268   : > { %v1402_v17 = vpop.permute.xlu0 %1401 }
 0x269   : > { %v1472_v38 = vsel %vm1461_vm5, %v1455_v3, %v1402_v17 }
 0x26a   : > { %v1495_v62 = vadd.f32 %v2434_v21, %v1472_v38  ;;  %v1404_v39 = vpop.permute.xlu1 %1403 }
 0x26b   : > { %v1473_v24 = vsel %vm1461_vm5, %v1456_v14, %v1404_v39 }
 0x26c   : > { %1512 = vst.msk [vmem:[%s2442_s25 + $0x50] sm:$0xff] %vm1501_vm6, %v1495_v62  ;;  %v1496_v12 = vadd.f32 %v2434_v21, %v1473_v24  ;;  %v1346_v1 = vpop.permute.xlu0 %1345 }
 0x26d   : > { %v1459_v5 = vsel %vm526_vm4, %v2417_v30, %v1346_v1 }
 0x26e   : > { %1513 = vst.msk [vmem:[%s2442_s25 + $0x58] sm:$0xff] %vm1501_vm6, %v1496_v12  ;;  %v1348_v43 = vpop.permute.xlu1 %1347 }
 0x26f   : > { %v1460_v32 = vsel %vm526_vm4, %v2421_v4, %v1348_v43 }
 0x270   : > { %v1398_v56 = vpop.permute.xlu0 %1397 }
 0x271   : > { %v1470_v51 = vsel %vm1461_vm5, %v1453_v0, %v1398_v56 }
 0x272   : > { %v1493_v46 = vadd.f32 %v2434_v21, %v1470_v51  ;;  %v1400_v49 = vpop.permute.xlu1 %1399 }
 0x273   : > { %v1471_v40 = vsel %vm1461_vm5, %v1454_v2, %v1400_v49 }
 0x274   : > { %1510 = vst.msk [vmem:[%s2442_s25 + $0x40] sm:$0xff] %vm1501_vm6, %v1493_v46  ;;  %v1494_v13 = vadd.f32 %v2434_v21, %v1471_v40  ;;  %v1342_v18 = vpop.permute.xlu0 %1341 }
 0x275   : > { %v1457_v61 = vsel %vm526_vm4, %v1441_v16, %v1342_v18 }
 0x276   : > { %1511 = vst.msk [vmem:[%s2442_s25 + $0x48] sm:$0xff] %vm1501_vm6, %v1494_v13  ;;  %v1344_v33 = vpop.permute.xlu1 %1343 }
 0x277   : > { %v1458_v48 = vsel %vm526_vm4, %v1442_v47, %v1344_v33 }
 0x278   : > { %v1406_v41 = vpop.permute.xlu0 %1405 }
 0x279   : > { %v1474_v19 = vsel %vm1461_vm5, %v1457_v61, %v1406_v41 }
 0x27a   : > { %v1497_v55 = vadd.f32 %v2434_v21, %v1474_v19  ;;  %v1408_v26 = vpop.permute.xlu1 %1407 }
 0x27b   : > { %v1475_v22 = vsel %vm1461_vm5, %v1458_v48, %v1408_v26 }
 0x27c   : > { %1514 = vst.msk [vmem:[%s2442_s25 + $0x60] sm:$0xff] %vm1501_vm6, %v1497_v55  ;;  %v1498_v31 = vadd.f32 %v2434_v21, %v1475_v22  ;;  %v1410_v57 = vpop.permute.xlu0 %1409 }
 0x27d   : > { %v1476_v25 = vsel %vm1461_vm5, %v1459_v5, %v1410_v57 }
 0x27e   : > { %1515 = vst.msk [vmem:[%s2442_s25 + $0x68] sm:$0xff] %vm1501_vm6, %v1498_v31  ;;  %v1499_v50 = vadd.f32 %v2434_v21, %v1476_v25  ;;  %v1412_v52 = vpop.permute.xlu1 %1411 }
 0x27f   : > { %v1477_v53 = vsel %vm1461_vm5, %v1460_v32, %v1412_v52 }
 0x280   : > { %1516 = vst.msk [vmem:[%s2442_s25 + $0x70] sm:$0xff] %vm1501_vm6, %v1499_v50  ;;  %v1500_v30 = vadd.f32 %v2434_v21, %v1477_v53 }
 0x282   : > { %1517 = vst.msk [vmem:[%s2442_s25 + $0x78] sm:$0xff] %vm1501_vm6, %v1500_v30 }
 0x283 PF: > { %s13_s16 = sadd.s32 1, %s1904_s16   ;;  %s2576_s12 = smov %s1896_s14 }
 0x284   : > { %p10_p7 = scmp.ge.s32.totalorder %s13_s16, 6   ;;  %s2577_s13 = smov %s1900_s15 }
 0x285   : > { %s2578_s14 = smov %s2581_s17  ;;  %s2579_s15 = smov %s2585_s18 }
 0x286   :  { %12 = sbr.rel (!%p10_p7) target bundleno = 3 (0x3), region = 65 }

</bundles_post_ra>
